<compile_context>
chip_gen: v5e
topology: v5e:2x2
jax: 0.10.0
libtpu: 0.0.40
codegen_flags: <defaults>
</compile_context>

<pallas_src>
import jax
import jax.numpy as jnp
from jax.experimental import pallas as pl
from jax.experimental.pallas import tpu as pltpu


def _outconv_kernel(x_ref, w_ref, b_ref, o_ref):
    # x_ref: (C_in, TL)   w_ref: (C_out, C_in)   b_ref: (C_out, 1)
    # o_ref: (C_out, TL)
    acc = jnp.dot(w_ref[...], x_ref[...], preferred_element_type=jnp.float32)
    o_ref[...] = (acc + b_ref[...]).astype(o_ref.dtype)


def outconv_pallas(x_ncl, weight, bias):
    """1x1 Conv1d forward, computed natively in NCL layout.

    Args:
      x_ncl:  (B, C_in, L)   float32   -- PyTorch NCL layout
      weight: (C_out, C_in)  float32   -- Conv1d weight squeezed over kernel dim
      bias:   (C_out,)       float32
    Returns:
      (B, C_out, L) float32
    """
    B, C_in, L = x_ncl.shape
    C_out = weight.shape[0]

    # Lane-axis tile along L.  Must be a multiple of 128 or equal to L.
    # TL=1024 keeps per-tile buffers a few MiB even for large channel counts,
    # fitting the double-buffered budget on v5e/v6e/v7x scoped VMEM defaults.
    if L <= 1024:
        TL = L
    else:
        TL = 1024

    b2d = bias.reshape(C_out, 1)  # (C_out, 1): broadcasts along lanes in-kernel

    out = pl.pallas_call(
        _outconv_kernel,
        out_shape=jax.ShapeDtypeStruct((B, C_out, L), x_ncl.dtype),
        grid=(B, pl.cdiv(L, TL)),
        in_specs=[
            # x: one batch row, one L-tile; C_in stays whole (it is the
            # contracting dim and equals the full array dim).
            pl.BlockSpec((None, C_in, TL), lambda b, l: (b, 0, l)),
            # weight / bias: grid-invariant VMEM residents.
            pl.BlockSpec((C_out, C_in), lambda b, l: (0, 0)),
            pl.BlockSpec((C_out, 1), lambda b, l: (0, 0)),
        ],
        out_specs=pl.BlockSpec((None, C_out, TL), lambda b, l: (b, 0, l)),
        compiler_params=pltpu.CompilerParams(
            dimension_semantics=("parallel", "parallel")),
    )(x_ncl, weight, b2d)

    return out


def _reference(x_ncl, weight, bias):
    # pure-JAX reference of Conv1d(kernel_size=1)
    return jnp.einsum("bcl,oc->bol", x_ncl, weight) + bias[None, :, None]


if __name__ == "__main__":
    key = jax.random.PRNGKey(0)
    k_x, k_w, k_b = jax.random.split(key, 3)

    B, C_in, C_out, L = 2, 4, 8, 16

    x = jax.random.normal(k_x, (B, C_in, L), dtype=jnp.float32)

    # Deterministic parameter init mimicking PyTorch Conv1d default
    # (uniform(-bound, bound), bound = 1/sqrt(fan_in) with kernel_size=1).
    bound = 1.0 / jnp.sqrt(jnp.float32(C_in))
    weight = jax.random.uniform(k_w, (C_out, C_in), jnp.float32, -bound, bound)
    bias = jax.random.uniform(k_b, (C_out,), jnp.float32, -bound, bound)

    out = outconv_pallas(x, weight, bias)
    jax.block_until_ready(out)

    ref = _reference(x, weight, bias)
    assert out.shape == (B, C_out, L)
    assert jnp.allclose(out, ref, atol=1e-5, rtol=1e-5)

    print("KERNEL_OK")
</pallas_src>

<mosaic_0001>
module attributes {stable_mosaic.version = 11 : i64} {
  func.func @_outconv_kernel(%arg0: i32, %arg1: i32, %arg2: memref<1x4x16xf32, #tpu.memory_space<vmem>>, %arg3: memref<8x4xf32, #tpu.memory_space<vmem>>, %arg4: memref<8x1xf32, #tpu.memory_space<vmem>>, %arg5: memref<1x8x16xf32, #tpu.memory_space<vmem>>) attributes {dimension_semantics = [#tpu.dimension_semantics<parallel>, #tpu.dimension_semantics<parallel>], iteration_bounds = array<i64: 2, 1>, scalar_prefetch = 0 : i64, scratch_operands = 0 : i64, tpu.core_type = #tpu.core_type<tc>, window_params = [{transform_indices = @transform_0, window_bounds = array<i64: 1, 4, 16>}, {pipeline_mode = #tpu.pipeline_mode<synchronous>, transform_indices = @transform_1, window_bounds = array<i64: 8, 4>}, {pipeline_mode = #tpu.pipeline_mode<synchronous>, transform_indices = @transform_2, window_bounds = array<i64: 8, 1>}, {transform_indices = @transform_3, window_bounds = array<i64: 1, 8, 16>}]} {
    %c0 = arith.constant 0 : index
    %c0_0 = arith.constant 0 : index
    %0 = vector.load %arg3[%c0, %c0_0] : memref<8x4xf32, #tpu.memory_space<vmem>>, vector<8x4xf32>
    %c0_1 = arith.constant 0 : index
    %c0_2 = arith.constant 0 : index
    %c0_3 = arith.constant 0 : index
    %1 = vector.load %arg2[%c0_1, %c0_2, %c0_3] : memref<1x4x16xf32, #tpu.memory_space<vmem>>, vector<1x4x16xf32>
    %2 = vector.shape_cast %1 : vector<1x4x16xf32> to vector<4x16xf32>
    %cst = arith.constant dense<0.000000e+00> : vector<8x16xf32>
    %3 = tpu.matmul %0, %2, %cst {dimension_numbers = #tpu.dot_dimension_numbers<[1], [0], [0], [1], [0, 0, 1, 1], [], []>} : vector<8x4xf32>, vector<4x16xf32>, vector<8x16xf32> -> vector<8x16xf32>
    %c0_4 = arith.constant 0 : index
    %c0_5 = arith.constant 0 : index
    %4 = vector.load %arg4[%c0_4, %c0_5] : memref<8x1xf32, #tpu.memory_space<vmem>>, vector<8x1xf32>
    %5 = vector.broadcast %4 : vector<8x1xf32> to vector<8x16xf32>
    %6 = arith.addf %3, %5 : vector<8x16xf32>
    %c0_6 = arith.constant 0 : index
    %c0_7 = arith.constant 0 : index
    %c0_8 = arith.constant 0 : index
    %7 = vector.load %arg5[%c0_6, %c0_7, %c0_8] : memref<1x8x16xf32, #tpu.memory_space<vmem>>, vector<1x8x16xf32>
    %8 = vector.shape_cast %7 : vector<1x8x16xf32> to vector<8x16xf32>
    %9 = vector.shape_cast %6 : vector<8x16xf32> to vector<1x8x16xf32>
    tpu.vector_store %arg5[%c0_6, %c0_7, %c0_8], %9 {strides = array<i32>} : memref<1x8x16xf32, #tpu.memory_space<vmem>>, vector<1x8x16xf32>,
    return
  }
  func.func @transform_0(%arg0: i32, %arg1: i32) -> (i32, i32, i32) {
    %c0_i32 = arith.constant 0 : i32
    %c0_i32_0 = arith.constant 0 : i32
    return %arg0, %c0_i32, %arg1 : i32, i32, i32
  }
  func.func @transform_1(%arg0: i32, %arg1: i32) -> (i32, i32) {
    %c0_i32 = arith.constant 0 : i32
    %c0_i32_0 = arith.constant 0 : i32
    %c0_i32_1 = arith.constant 0 : i32
    return %c0_i32, %c0_i32_0 : i32, i32
  }
  func.func @transform_2(%arg0: i32, %arg1: i32) -> (i32, i32) {
    %c0_i32 = arith.constant 0 : i32
    %c0_i32_0 = arith.constant 0 : i32
    %c0_i32_1 = arith.constant 0 : i32
    return %c0_i32, %c0_i32_0 : i32, i32
  }
  func.func @transform_3(%arg0: i32, %arg1: i32) -> (i32, i32, i32) {
    %c0_i32 = arith.constant 0 : i32
    %c0_i32_0 = arith.constant 0 : i32
    return %arg0, %c0_i32, %arg1 : i32, i32, i32
  }
}

</mosaic_0001>

<bundles_post_ra>
// kernel: tpu_custom_call.1
= control target key start
LH: loop header
LB: loop body
LE: loop exit
PB: predicated region body
PF: predicated region fallthrough
CT: control target
= control target key end

     0   :  { %8 = vsyncpa [#allocation3], 0  ;;  %s591_s0 = inlined_call_operand.vmem [shape: f32[2,4,16], index: 0, kind: input, shape index: {}]   ;;  %s592_s1 = inlined_call_operand.vmem [shape: f32[8,4], index: 1, kind: input, shape index: {}]   ;;  %s593_s2 = inlined_call_operand.vmem [shape: f32[8,1], index: 2, kind: input, shape index: {}]   ;;  %s594_s3 = inlined_call_operand.hbm [shape: f32[2,8,16], index: 3, kind: output, shape index: {}]  }
   0x1   :  { %10 = vsyncpa [#allocation3 + $0x1], 0  ;;  %s488_s12 = smov 0   ;;  %s490_s13 = smov 0  }
   0x2   :  { %s492_s14 = smov 0   ;;  %s494_s15 = smov 0  }
   0x3   :  { %s496_s16 = smov 0   ;;  %s498_s17 = smov 0  }
   0x4 LB: > { %s317_s18 = sadd.s32 4294967295, %s465_s17   ;;  %s318_s19 = sadd.s32 4294967294, %s465_s17   ;;  %s465_s17 = sphi %s498_s17, %s16_s17   ;;  %s461_s16 = sphi %s496_s16, %s601_s16   ;;  %s457_s15 = sphi %s494_s15, %s600_s15   ;;  %s453_s14 = sphi %s492_s14, %s599_s14   ;;  %s449_s13 = sphi %s490_s13, %s598_s13   ;;  %s445_s12 = sphi %s488_s12, %s597_s12  }
   0x5   : > { %s28_s20 = sadd.s32 1, %s461_s16  ;;  %s107_s21 = sadd.s32 1, %s453_s14 }
   0x6   : > { %p30_p0 = scmp.ge.s32.totalorder %s28_s20, 2  ;;  %p117_p1 = scmp.ne.s32.totalorder %s453_s14, %s449_s13 }
   0x7   : > { %p118_p2 = scmp.eq.s32.totalorder %s317_s18, 1  ;;  %p123_p3 = scmp.ne.s32.totalorder %s449_s13, %s445_s12 }
   0x8   : > { %s603_s20 = smov (%p30_p0, %s28_s20), 0  ;;  %p124_p5 = scmp.eq.s32.totalorder %s318_s19, 1 }
   0x9   : > { %p528_p4 = por %p118_p2, %p117_p1  ;;  %s102_s23 = ssub.s32 %s461_s16, %s603_s20 }
   0xa   : > { %p321_p6 = scmp.ge.s32.totalorder %s465_s17, 1  ;;  %p105_p7 = scmp.eq.s32.totalorder %s102_s23, 0 }
   0xb   : > { %p535_p8 = por %p124_p5, %p123_p3  ;;  %p158_p9 = scmp.lt.s32.totalorder %s465_s17, 3 }
   0xc   : > { %s541_s25 = scalar_select %p105_p7, %s453_s14, %s107_s21  }
   0xd   : > { %p159_p10 = pnand %p321_p6, %p158_p9 }
   0xe   : > { %p184_p11 = scmp.lt.s32.totalorder (!%p159_p10), %s457_s15, 1  ;;  %s181_s8 = sand.u32 (!%p159_p10), 1, %s449_s13  }
   0xf   : > { %162 = sbr.rel (%p159_p10) target bundleno = 157 (0x9d), region = 32  ;;  %s322_s9 = sshll.u32 (!%p159_p10), %s181_s8, 3 }
  0x10   : > { %s327_s10 = sshll.u32 (!%p159_p10), %s457_s15, 3  ;;  %s183_s21 = scalar_lea.vmem (!%p159_p10), [#allocation2], %s322_s9 }
  0x11   : > { %s241_s19 = scalar_lea.hbm (!%p159_p10), %s594_s3, %s327_s10  ;;  %s243_s23 = sshll.u32 (!%p159_p10), %s183_s21, 4  ;;  %s244_s23 = int_to_ptr.vmem [resolvable:$true] %s243_s23 }
  0x12   : > { %s245_s26 = sshll.u32 (!%p159_p10), %s241_s19, 4  ;;  %s230_s27 = scalar_lea.sflag (!%p159_p10), [#allocation3], %s181_s8  ;;  %s246_s26 = int_to_ptr.hbm [resolvable:$true] %s245_s26 }
  0x13   : > { %s407_s4 = scalar_lea.hbm (!%p159_p10), %s594_s3, 16 }
  0x14   : > { %v193_v0 = vld [vmem:[%s593_s2] sm:$0xff]  ;;  %v467_v1 = vmov 0   ;;  %s185_s28 = scalar_select %p184_p11, %s457_s15, 1  ;;  %vm203_vm0 = vcmask 1043456   ;;  %vm199_vm1 = vcmask 31744   ;;  %vm227_vm2 = vcmask 130048  }
  0x15   : > { %386 = vset.pattern.permute.xlu0 %v467_v1  ;;  %v191_v2 = vld [vmem:[%s592_s1] sm:$0xff] }
  0x16   : > { %196 = vperm.xlu0 %386, %v193_v0   ;;  %s323_s29 = sshll.u32 %s185_s28, 2  ;;  %s401_s28 = sshra.s32 %s246_s26, 4  ;;  %s402_s28 = int_to_ptr.hbm [resolvable:$true] %s401_s28 }
  0x17   : > { %s190_s5 = scalar_lea.vmem %s591_s0, %s323_s29  ;;  %s403_s29 = scalar_lea.hbm %s402_s28, 8 }
  0x18   : > { %v192_v3 = vld [vmem:[%s190_s5] sm:$0xf]  ;;  %p404_p12 = scmp.ne.s32.totalorder %s402_s28, %s403_s29  ;;  %p408_p1 = scmp.lt.s32.totalorder %s402_s28, %s594_s3 }
  0x19   : > { %324 = vmatpush.msk.msra.mxu0 %vm203_vm0, %v192_v3  ;;  %p409_p2 = scmp.lt.s32.totalorder %s407_s4, %s403_s29 }
  0x1a   : > { %325 = vmatmul.msk.f32.vlgmr.msra.gmra.mxu0 %vm199_vm1, %v191_v2  ;;  %p405_p13 = pnand %p404_p12, %p528_p4 }
  0x1b   : > { %p410_p3 = por %p409_p2, %p408_p1 }
  0x1c   : > { %p406_p0 = pneg %p405_p13 }
  0x1e   : > { %p411_p5 = pnand %p410_p3, %p406_p0 }
  0x88   : > { %v197_v4 = vpop.permute.xlu0 %196 }
  0x97   : > { %v224_v5 = vpop.f32.mrf.mxu0 }
  0x98   : > { %v225_v6 = vadd.f32 %v224_v5, %v197_v4 }
  0x9a   : > { %228 = vst.msk [vmem:[%s183_s21] sm:$0xff] %vm227_vm2, %v225_v6 }
  0x9b   : > { %414 = shalt.err (!%p411_p5)
}
  0x9c   : > { %330 = dma.vmem_to_hbm [thread:$0]  (%p528_p4), %s244_s23, 128, %s246_s26, %s230_s27  }
  0x9d PF: > { %p336_p6 = scmp.ge.s32.totalorder %s465_s17, 2  ;;  %s257_s7 = sand.u32 1, %s445_s12  }
  0x9e   : > { %s258_s8 = scalar_lea.sflag [#allocation3], %s257_s7 }
  0x9f   : > { %p333_p7 = pnand %p336_p6, %p535_p8 }
  0xa1   : > { %p334_p9 = pneg %p333_p7 }
  0xa3   : > { %440 = dma.done.wait (%p334_p9), %s258_s8, 128  }
  0xa4   : > { %442 = vsyncadd (%p334_p9), %s258_s8, 4294967168  ;;  %s16_s17 = sadd.s32 1, %s465_s17   ;;  %s597_s12 = smov %s449_s13 }
  0xa5   : > { %p13_p10 = scmp.ge.s32.totalorder %s16_s17, 4   ;;  %s598_s13 = smov %s453_s14 }
  0xa6   : > { %s599_s14 = smov %s541_s25  ;;  %s600_s15 = smov %s461_s16 }
  0xa7   : > { %s601_s16 = smov %s603_s20  ;;  %15 = sbr.rel (!%p13_p10) target bundleno = 4 (0x4), region = 67 }
  0xac   :  { %264 = vsyncpa [#allocation3], 1 }
  0xad   :  { %266 = vsyncpa [#allocation3 + $0x1], 1 }

</bundles_post_ra>
